<compile_context>
chip_gen: v7x
topology: tpu7x:2x2x1
jax: 0.10.0
libtpu: 0.0.40
codegen_flags: <defaults>
</compile_context>

<pallas_src>
from functools import partial

import jax
import jax.numpy as jnp
from jax.experimental import pallas as pl
from jax.experimental.pallas import tpu as pltpu

NR_CLASSES = 28        # self.nr_classes
NC_PAD = 128           # pad classifier output to one lane-tile
BN_EPS = 1e-5          # nn.BatchNorm2d default eps
DIM = 1024             # self.dim for densenet121
MAX_THW = 512          # HW rows streamed per grid step (multiple of 128)


def _head_kernel(feat_ref, scale_ref, shift_ref, w_ref, b_ref,
                 nhwc_ref, logits_ref, acc_ref, *, hw_total, thw):
    """feat_ref: (1, C, THW) native dtype; scale/shift: (1, C) f32;
    w: (C, NC_PAD); b: (1, NC_PAD); nhwc_ref: (1, THW, C);
    logits_ref: (1, 1, NC_PAD); acc_ref: (1, C) f32 scratch."""
    hw_idx = pl.program_id(1)

    @pl.when(hw_idx == 0)
    def _():
        acc_ref[...] = jnp.zeros_like(acc_ref)

    # (C, THW) tile of the NCHW feature map -> f32 -> channels-last (THW, C).
    # The transpose rides the otherwise-idle XLU slot.
    xt = feat_ref[0].astype(jnp.float32).T                      # (THW, C)

    # Fused NCHW -> NHWC permute output (original, un-normalized features).
    nhwc_ref[0] = xt.astype(nhwc_ref.dtype)

    # BatchNorm (eval, folded) + ReLU; accumulate channel sums for avg-pool.
    y = jnp.maximum(xt * scale_ref[...] + shift_ref[...], 0.0)  # (THW, C)
    if hw_total % thw != 0:
        # Mask padded rows of the ragged last HW tile before accumulating.
        row = jax.lax.broadcasted_iota(jnp.int32, (thw, 1), 0) + hw_idx * thw
        y = jnp.where(row < hw_total, y, 0.0)
    acc_ref[...] += jnp.sum(y, axis=0, keepdims=True)           # (1, C)

    @pl.when(hw_idx == pl.num_programs(1) - 1)
    def _():
        pooled = acc_ref[...] * (1.0 / hw_total)                # (1, C)
        logits_ref[0] = (
            jnp.dot(pooled, w_ref[...], preferred_element_type=jnp.float32)
            + b_ref[...]
        )


def init_params(key, dim=DIM):
    ks = jax.random.split(key, 6)
    bn_gamma = jax.random.uniform(ks[0], (1, dim), jnp.float32, 0.5, 1.5)
    bn_beta = 0.1 * jax.random.normal(ks[1], (1, dim), jnp.float32)
    bn_mean = 0.1 * jax.random.normal(ks[2], (1, dim), jnp.float32)
    bn_var = jax.random.uniform(ks[3], (1, dim), jnp.float32, 0.5, 1.5)
    fc_w = jax.random.normal(ks[4], (dim, NR_CLASSES), jnp.float32) / jnp.sqrt(dim)
    fc_b = 0.01 * jax.random.normal(ks[5], (1, NR_CLASSES), jnp.float32)
    fc_w_pad = jnp.zeros((dim, NC_PAD), jnp.float32).at[:, :NR_CLASSES].set(fc_w)
    fc_b_pad = jnp.zeros((1, NC_PAD), jnp.float32).at[:, :NR_CLASSES].set(fc_b)
    return dict(bn_gamma=bn_gamma, bn_beta=bn_beta, bn_mean=bn_mean,
                bn_var=bn_var, fc_w=fc_w, fc_b=fc_b,
                fc_w_pad=fc_w_pad, fc_b_pad=fc_b_pad)


def classifying_encoder_forward(img_features_nchw, params):
    """Returns (img_features_nhwc, class_preds_logits), like the torch module."""
    B, C, H, W = img_features_nchw.shape
    HW = H * W
    dt = img_features_nchw.dtype

    # Fold BN(eval) into one scale/shift pair (outside the kernel, done once).
    scale = params["bn_gamma"] * jax.lax.rsqrt(params["bn_var"] + BN_EPS)  # (1, C)
    shift = params["bn_beta"] - params["bn_mean"] * scale                  # (1, C)

    # Free, contiguous reshape of the NCHW tensor; transpose happens in-kernel.
    feat_flat = img_features_nchw.reshape(B, C, HW)

    # HW tile: multiple of 128 when streaming, else the full (small) extent.
    thw = HW if HW <= MAX_THW else MAX_THW
    n_hw = pl.cdiv(HW, thw)

    kernel = partial(_head_kernel, hw_total=HW, thw=thw)

    nhwc_flat, logits_pad = pl.pallas_call(
        kernel,
        out_shape=(
            jax.ShapeDtypeStruct((B, HW, C), dt),              # permuted features
            jax.ShapeDtypeStruct((B, 1, NC_PAD), jnp.float32),  # padded logits
        ),
        grid_spec=pltpu.PrefetchScalarGridSpec(
            num_scalar_prefetch=0,
            grid=(B, n_hw),
            in_specs=[
                pl.BlockSpec((1, C, thw), lambda b, hw: (b, 0, hw)),   # features
                pl.BlockSpec((1, C), lambda b, hw: (0, 0)),            # bn scale
                pl.BlockSpec((1, C), lambda b, hw: (0, 0)),            # bn shift
                pl.BlockSpec((C, NC_PAD), lambda b, hw: (0, 0)),       # fc weight
                pl.BlockSpec((1, NC_PAD), lambda b, hw: (0, 0)),       # fc bias
            ],
            out_specs=[
                pl.BlockSpec((1, thw, C), lambda b, hw: (b, hw, 0)),   # NHWC feats
                pl.BlockSpec((1, 1, NC_PAD), lambda b, hw: (b, 0, 0)),  # logits
            ],
            scratch_shapes=[pltpu.VMEM((1, C), jnp.float32)],          # pooled sum
        ),
        compiler_params=pltpu.CompilerParams(
            dimension_semantics=("parallel", "arbitrary")),
    )(feat_flat, scale, shift, params["fc_w_pad"], params["fc_b_pad"])

    feat_nhwc = nhwc_flat.reshape(B, H, W, C)
    class_preds_logits = logits_pad[:, 0, :NR_CLASSES]
    return feat_nhwc, class_preds_logits


def reference_forward(img_features_nchw, params):
    """Pure-JAX reference mirroring the PyTorch forward exactly (f32 math)."""
    x = img_features_nchw.astype(jnp.float32)
    gamma = params["bn_gamma"][0][None, :, None, None]
    beta = params["bn_beta"][0][None, :, None, None]
    mean = params["bn_mean"][0][None, :, None, None]
    var = params["bn_var"][0][None, :, None, None]
    y = (x - mean) / jnp.sqrt(var + BN_EPS) * gamma + beta
    y = jnp.maximum(y, 0.0)
    pooled = jnp.mean(y, axis=(2, 3))                        # (B, C)
    logits = pooled @ params["fc_w"] + params["fc_b"][0]
    feat_nhwc = jnp.transpose(x, (0, 2, 3, 1))
    return feat_nhwc, logits


if __name__ == "__main__":
    key = jax.random.PRNGKey(0)
    k_feat, k_param, k_feat2 = jax.random.split(key, 3)

    params = init_params(k_param, dim=DIM)
    fwd = jax.jit(classifying_encoder_forward)

    # Case 1: small f32 feature map (single-tile path), B=2, C=1024, 4x4.
    B, H, W = 2, 4, 4
    img_features = jax.random.normal(k_feat, (B, DIM, H, W), jnp.float32)
    feats_out, logits_out = fwd(img_features, params)
    jax.block_until_ready((feats_out, logits_out))

    feats_ref, logits_ref = reference_forward(img_features, params)
    assert feats_out.shape == (B, H, W, DIM)
    assert logits_out.shape == (B, NR_CLASSES)
    assert jnp.allclose(feats_out, feats_ref, rtol=1e-5, atol=1e-5)
    assert jnp.allclose(logits_out, logits_ref, rtol=1e-3, atol=1e-3)

    # Case 2: bf16 features (native-dtype DMA) with HW=900 -> streamed HW
    # tiles (THW=512) including a masked ragged last tile.
    B2, H2, W2 = 2, 30, 30
    img_bf16 = jax.random.normal(
        k_feat2, (B2, DIM, H2, W2), jnp.float32).astype(jnp.bfloat16)
    feats2, logits2 = fwd(img_bf16, params)
    jax.block_until_ready((feats2, logits2))

    feats2_ref, logits2_ref = reference_forward(img_bf16, params)
    assert feats2.shape == (B2, H2, W2, DIM)
    assert feats2.dtype == jnp.bfloat16
    assert jnp.allclose(feats2.astype(jnp.float32), feats2_ref,
                        rtol=1e-5, atol=1e-5)
    assert jnp.allclose(logits2, logits2_ref, rtol=1e-3, atol=1e-3)

    print("KERNEL_OK")
</pallas_src>

<mosaic_0001>
module attributes {stable_mosaic.version = 11 : i64} {
  func.func @_head_kernel(%arg0: i32, %arg1: i32, %arg2: memref<1x1024x16xf32, #tpu.memory_space<vmem>>, %arg3: memref<1x1024xf32, #tpu.memory_space<vmem>>, %arg4: memref<1x1024xf32, #tpu.memory_space<vmem>>, %arg5: memref<1024x128xf32, #tpu.memory_space<vmem>>, %arg6: memref<1x128xf32, #tpu.memory_space<vmem>>, %arg7: memref<1x16x1024xf32, #tpu.memory_space<vmem>>, %arg8: memref<1x1x128xf32, #tpu.memory_space<vmem>>, %arg9: memref<1x1024xf32, #tpu.memory_space<vmem>>) attributes {dimension_semantics = [#tpu.dimension_semantics<parallel>, #tpu.dimension_semantics<arbitrary>], iteration_bounds = array<i64: 2, 1>, scalar_prefetch = 0 : i64, scratch_operands = 1 : i64, tpu.core_type = #tpu.core_type<tc>, window_params = [{transform_indices = @transform_0, window_bounds = array<i64: 1, 1024, 16>}, {pipeline_mode = #tpu.pipeline_mode<synchronous>, transform_indices = @transform_1, window_bounds = array<i64: 1, 1024>}, {pipeline_mode = #tpu.pipeline_mode<synchronous>, transform_indices = @transform_2, window_bounds = array<i64: 1, 1024>}, {pipeline_mode = #tpu.pipeline_mode<synchronous>, transform_indices = @transform_3, window_bounds = array<i64: 1024, 128>}, {pipeline_mode = #tpu.pipeline_mode<synchronous>, transform_indices = @transform_4, window_bounds = array<i64: 1, 128>}, {transform_indices = @transform_5, window_bounds = array<i64: 1, 16, 1024>}, {transform_indices = @transform_6, window_bounds = array<i64: 1, 1, 128>}]} {
    %c0_i32 = arith.constant 0 : i32
    %0 = arith.cmpi eq, %arg1, %c0_i32 : i32
    %1 = arith.extui %0 : i1 to i32
    %c0_i32_0 = arith.constant 0 : i32
    %2 = arith.cmpi ne, %1, %c0_i32_0 : i32
    scf.if %2 {
      %cst_17 = arith.constant 0.000000e+00 : f32
      %25 = vector.broadcast %cst_17 : f32 to vector<1x1024xf32>
      %c0_18 = arith.constant 0 : index
      %c0_19 = arith.constant 0 : index
      %26 = vector.load %arg9[%c0_18, %c0_19] : memref<1x1024xf32, #tpu.memory_space<vmem>>, vector<1x1024xf32>
      tpu.vector_store %arg9[%c0_18, %c0_19], %25 {strides = array<i32>} : memref<1x1024xf32, #tpu.memory_space<vmem>>, vector<1x1024xf32>,
    } else {
    }
    %c0 = arith.constant 0 : index
    %c0_1 = arith.constant 0 : index
    %c0_2 = arith.constant 0 : index
    %3 = vector.load %arg2[%c0, %c0_1, %c0_2] : memref<1x1024x16xf32, #tpu.memory_space<vmem>>, vector<1x1024x16xf32>
    %4 = vector.shape_cast %3 : vector<1x1024x16xf32> to vector<1024x16xf32>
    %5 = tpu.transpose %4, [1, 0] : vector<1024x16xf32> -> vector<16x1024xf32>
    %c0_3 = arith.constant 0 : index
    %c0_4 = arith.constant 0 : index
    %c0_5 = arith.constant 0 : index
    %6 = vector.load %arg7[%c0_3, %c0_4, %c0_5] : memref<1x16x1024xf32, #tpu.memory_space<vmem>>, vector<1x16x1024xf32>
    %7 = vector.shape_cast %6 : vector<1x16x1024xf32> to vector<16x1024xf32>
    %8 = vector.shape_cast %5 : vector<16x1024xf32> to vector<1x16x1024xf32>
    tpu.vector_store %arg7[%c0_3, %c0_4, %c0_5], %8 {strides = array<i32>} : memref<1x16x1024xf32, #tpu.memory_space<vmem>>, vector<1x16x1024xf32>,
    %c0_6 = arith.constant 0 : index
    %c0_7 = arith.constant 0 : index
    %9 = vector.load %arg3[%c0_6, %c0_7] : memref<1x1024xf32, #tpu.memory_space<vmem>>, vector<1x1024xf32>
    %10 = vector.broadcast %9 : vector<1x1024xf32> to vector<16x1024xf32>
    %11 = arith.mulf %5, %10 : vector<16x1024xf32>
    %c0_8 = arith.constant 0 : index
    %c0_9 = arith.constant 0 : index
    %12 = vector.load %arg4[%c0_8, %c0_9] : memref<1x1024xf32, #tpu.memory_space<vmem>>, vector<1x1024xf32>
    %13 = vector.broadcast %12 : vector<1x1024xf32> to vector<16x1024xf32>
    %14 = arith.addf %11, %13 : vector<16x1024xf32>
    %cst = arith.constant 0.000000e+00 : f32
    %15 = vector.broadcast %cst : f32 to vector<16x1024xf32>
    %16 = arith.maximumf %14, %15 : vector<16x1024xf32>
    %c0_10 = arith.constant 0 : index
    %c0_11 = arith.constant 0 : index
    %17 = vector.load %arg9[%c0_10, %c0_11] : memref<1x1024xf32, #tpu.memory_space<vmem>>, vector<1x1024xf32>
    %cst_12 = arith.constant dense<0.000000e+00> : vector<1024xf32>
    %18 = vector.multi_reduction <add>, %16, %cst_12 [0] : vector<16x1024xf32> to vector<1024xf32>
    %19 = vector.shape_cast %18 : vector<1024xf32> to vector<1x1024xf32>
    %20 = arith.addf %17, %19 : vector<1x1024xf32>
    %c0_13 = arith.constant 0 : index
    %c0_14 = arith.constant 0 : index
    %21 = vector.load %arg9[%c0_13, %c0_14] : memref<1x1024xf32, #tpu.memory_space<vmem>>, vector<1x1024xf32>
    tpu.vector_store %arg9[%c0_13, %c0_14], %20 {strides = array<i32>} : memref<1x1024xf32, #tpu.memory_space<vmem>>, vector<1x1024xf32>,
    %c0_i32_15 = arith.constant 0 : i32
    %22 = arith.cmpi eq, %arg1, %c0_i32_15 : i32
    %23 = arith.extui %22 : i1 to i32
    %c0_i32_16 = arith.constant 0 : i32
    %24 = arith.cmpi ne, %23, %c0_i32_16 : i32
    scf.if %24 {
      %c0_17 = arith.constant 0 : index
      %c0_18 = arith.constant 0 : index
      %25 = vector.load %arg9[%c0_17, %c0_18] : memref<1x1024xf32, #tpu.memory_space<vmem>>, vector<1x1024xf32>
      %cst_19 = arith.constant 6.250000e-02 : f32
      %26 = vector.broadcast %cst_19 : f32 to vector<1x1024xf32>
      %27 = arith.mulf %25, %26 : vector<1x1024xf32>
      %c0_20 = arith.constant 0 : index
      %c0_21 = arith.constant 0 : index
      %28 = vector.load %arg5[%c0_20, %c0_21] : memref<1024x128xf32, #tpu.memory_space<vmem>>, vector<1024x128xf32>
      %cst_22 = arith.constant dense<0.000000e+00> : vector<1x128xf32>
      %29 = tpu.matmul %27, %28, %cst_22 {dimension_numbers = #tpu.dot_dimension_numbers<[1], [0], [0], [1], [0, 0, 1, 1], [], []>} : vector<1x1024xf32>, vector<1024x128xf32>, vector<1x128xf32> -> vector<1x128xf32>
      %c0_23 = arith.constant 0 : index
      %c0_24 = arith.constant 0 : index
      %30 = vector.load %arg6[%c0_23, %c0_24] : memref<1x128xf32, #tpu.memory_space<vmem>>, vector<1x128xf32>
      %31 = arith.addf %29, %30 : vector<1x128xf32>
      %c0_25 = arith.constant 0 : index
      %c0_26 = arith.constant 0 : index
      %c0_27 = arith.constant 0 : index
      %32 = vector.load %arg8[%c0_25, %c0_26, %c0_27] : memref<1x1x128xf32, #tpu.memory_space<vmem>>, vector<1x1x128xf32>
      %33 = vector.shape_cast %32 : vector<1x1x128xf32> to vector<1x128xf32>
      %34 = vector.shape_cast %31 : vector<1x128xf32> to vector<1x1x128xf32>
      tpu.vector_store %arg8[%c0_25, %c0_26, %c0_27], %34 {strides = array<i32>} : memref<1x1x128xf32, #tpu.memory_space<vmem>>, vector<1x1x128xf32>,
    } else {
    }
    return
  }
  func.func @transform_0(%arg0: i32, %arg1: i32) -> (i32, i32, i32) {
    %c0_i32 = arith.constant 0 : i32
    %c0_i32_0 = arith.constant 0 : i32
    return %arg0, %c0_i32, %arg1 : i32, i32, i32
  }
  func.func @transform_1(%arg0: i32, %arg1: i32) -> (i32, i32) {
    %c0_i32 = arith.constant 0 : i32
    %c0_i32_0 = arith.constant 0 : i32
    %c0_i32_1 = arith.constant 0 : i32
    return %c0_i32, %c0_i32_0 : i32, i32
  }
  func.func @transform_2(%arg0: i32, %arg1: i32) -> (i32, i32) {
    %c0_i32 = arith.constant 0 : i32
    %c0_i32_0 = arith.constant 0 : i32
    %c0_i32_1 = arith.constant 0 : i32
    return %c0_i32, %c0_i32_0 : i32, i32
  }
  func.func @transform_3(%arg0: i32, %arg1: i32) -> (i32, i32) {
    %c0_i32 = arith.constant 0 : i32
    %c0_i32_0 = arith.constant 0 : i32
    %c0_i32_1 = arith.constant 0 : i32
    return %c0_i32, %c0_i32_0 : i32, i32
  }
  func.func @transform_4(%arg0: i32, %arg1: i32) -> (i32, i32) {
    %c0_i32 = arith.constant 0 : i32
    %c0_i32_0 = arith.constant 0 : i32
    %c0_i32_1 = arith.constant 0 : i32
    return %c0_i32, %c0_i32_0 : i32, i32
  }
  func.func @transform_5(%arg0: i32, %arg1: i32) -> (i32, i32, i32) {
    %c0_i32 = arith.constant 0 : i32
    %c0_i32_0 = arith.constant 0 : i32
    return %arg0, %arg1, %c0_i32 : i32, i32, i32
  }
  func.func @transform_6(%arg0: i32, %arg1: i32) -> (i32, i32, i32) {
    %c0_i32 = arith.constant 0 : i32
    %c0_i32_0 = arith.constant 0 : i32
    %c0_i32_1 = arith.constant 0 : i32
    return %arg0, %c0_i32, %c0_i32_0 : i32, i32, i32
  }
}

</mosaic_0001>

<bundles_post_ra>
// kernel: classifying_encoder_forward.1
= control target key start
LH: loop header
LB: loop body
LE: loop exit
PB: predicated region body
PF: predicated region fallthrough
CT: control target
= control target key end

     0   :  { %12 = vsyncpa [#allocation4], 0  ;;  %s2768_s0 = inlined_call_operand.vmem [shape: f32[2,1024,16], index: 0, kind: input, shape index: {}]   ;;  %s2769_s1 = inlined_call_operand.vmem [shape: f32[1,1024], index: 1, kind: input, shape index: {}]   ;;  %s2770_s2 = inlined_call_operand.vmem [shape: f32[1,1024], index: 2, kind: input, shape index: {}]   ;;  %s2771_s3 = inlined_call_operand.vmem [shape: f32[1024,128], index: 3, kind: input, shape index: {}]   ;;  %s2772_s4 = inlined_call_operand.vmem [shape: f32[1,128], index: 4, kind: input, shape index: {}]   ;;  %s2773_s5 = inlined_call_operand.vmem [shape: f32[2,16,1024], index: 5, kind: output, shape index: {0}]   ;;  %s2774_s6 = inlined_call_operand.hbm [shape: f32[2,1,128], index: 6, kind: output, shape index: {1}]  }
   0x1   :  { %14 = vsyncpa [#allocation4 + $0x1], 0  ;;  %s2001_s21 = smov 0   ;;  %s2003_s22 = smov 0  }
   0x2   :  { %s2005_s23 = smov 0   ;;  %s2007_s24 = smov 0  }
   0x3   :  { %s2009_s25 = smov 0   ;;  %s2011_s26 = smov 0  }
   0x4 LB: > { %s1546_s27 = sadd.s32 4294967295, %s1962_s26   ;;  %s1547_s28 = sadd.s32 4294967294, %s1962_s26   ;;  %s1962_s26 = sphi %s2011_s26, %s20_s26   ;;  %s1958_s25 = sphi %s2009_s25, %s2781_s25   ;;  %s1954_s24 = sphi %s2007_s24, %s2780_s24   ;;  %s1950_s23 = sphi %s2005_s23, %s2779_s23   ;;  %s1946_s22 = sphi %s2003_s22, %s2778_s22   ;;  %s1942_s21 = sphi %s2001_s21, %s2777_s21  }
   0x5   : > { %s32_s29 = sadd.s32 1, %s1958_s25  ;;  %s179_s30 = sadd.s32 1, %s1950_s23 }
   0x6   : > { %p34_p0 = scmp.ge.s32.totalorder %s32_s29, 2  ;;  %p189_p1 = scmp.ne.s32.totalorder %s1950_s23, %s1946_s22 }
   0x7   : > { %p190_p2 = scmp.eq.s32.totalorder %s1546_s27, 1  ;;  %p195_p3 = scmp.ne.s32.totalorder %s1946_s22, %s1942_s21 }
   0x8   : > { %s2783_s29 = smov (%p34_p0, %s32_s29), 0  ;;  %p196_p5 = scmp.eq.s32.totalorder %s1547_s28, 1 }
   0x9   : > { %p2041_p4 = por %p190_p2, %p189_p1  ;;  %s176_s8 = ssub.s32 %s1958_s25, %s2783_s29 }
   0xa   : > { %p1550_p6 = scmp.ge.s32.totalorder %s1962_s26, 1  ;;  %p177_p7 = scmp.eq.s32.totalorder %s176_s8, 0 }
   0xb   : > { %p2048_p8 = por %p196_p5, %p195_p3  ;;  %p237_p9 = scmp.lt.s32.totalorder %s1962_s26, 3 }
   0xc   : > { %s2054_s10 = scalar_select %p177_p7, %s1950_s23, %s179_s30  }
   0xd   : > { %p238_p10 = pnand %p1550_p6, %p237_p9 }
   0xe   : > { %p279_p11 = scmp.lt.s32.totalorder (!%p238_p10), %s1954_s24, 1  ;;  %s277_s8 = sand.u32 (!%p238_p10), 1, %s1946_s22  }
   0xf   : > { %241 = sbr.rel (%p238_p10) target bundleno = 653 (0x28d), region = 40 }
  0x16   : > { %s2058_s11 = scalar_select %p279_p11, %s1954_s24, 1 }
  0x18   : > { %s1558_s12 = sshll.u32 %s2058_s11, 10  ;;  %s1559_s16 = sshll.u32 %s2058_s11, 7 }
  0x19   : > { %s2064_s15 = scalar_lea.vmem %s2768_s0, %s1558_s12  ;;  %s2136_s19 = scalar_lea.vmem %s2773_s5, %s1559_s16 }
  0x1a   : > { %v319_v0 = vld [vmem:[%s2064_s15 + $0x80] sm:$0xff]  ;;  %v320_v2 = vld [vmem:[%s2064_s15 + $0x88] sm:$0xff]  ;;  %v321_v4 = vld [vmem:[%s2064_s15 + $0x90] sm:$0xff]  ;;  %s1555_s11 = sshll.u32 %s1954_s24, 4  ;;  %s278_s12 = scalar_lea.vmem [#allocation3], %s277_s8 }
  0x1b   : > { %v303_v1 = vld [vmem:[%s2064_s15] sm:$0xff]  ;;  %463 = vxpose.xlu1.b32.start [1/16] (narrow) %v319_v0, 16  ;;  %v304_v3 = vld [vmem:[%s2064_s15 + $0x8] sm:$0xff]  ;;  %v305_v5 = vld [vmem:[%s2064_s15 + $0x10] sm:$0xff]  ;;  %v705_v0 = vlaneseq  ;;  %s1435_s13 = sshll.u32 %s278_s12, 4  ;;  %s2721_s14 = scalar_lea.hbm %s2774_s6, %s1555_s11  ;;  %s2723_s13 = int_to_ptr.vmem [resolvable:$true] %s1435_s13 }
  0x1c   : > { %431 = vxpose.xlu0.b32.start [1/16] (narrow) %v303_v1, 16  ;;  %v322_v6 = vld [vmem:[%s2064_s15 + $0x98] sm:$0xff]  ;;  %v323_v8 = vld [vmem:[%s2064_s15 + $0xa0] sm:$0xff]  ;;  %v324_v10 = vld [vmem:[%s2064_s15 + $0xa8] sm:$0xff]  ;;  %s1419_s16 = scalar_lea.sflag [#allocation4], %s277_s8  ;;  %s1884_s17 = scalar_lea.vmem %s2723_s13, 16 }
  0x1d   : > { %v306_v7 = vld [vmem:[%s2064_s15 + $0x18] sm:$0xff]  ;;  %v307_v9 = vld [vmem:[%s2064_s15 + $0x20] sm:$0xff]  ;;  %v308_v11 = vld [vmem:[%s2064_s15 + $0x28] sm:$0xff]  ;;  %p1885_p12 = scmp.ne.s32.totalorder %s2723_s13, %s1884_s17  ;;  %s1965_s24 = smov [#allocation3]  }
  0x1e   : > { %v325_v12 = vld [vmem:[%s2064_s15 + $0xb0] sm:$0xff]  ;;  %v326_v14 = vld [vmem:[%s2064_s15 + $0xb8] sm:$0xff]  ;;  %v327_v16 = vld [vmem:[%s2064_s15 + $0xc0] sm:$0xff]  ;;  %s1888_s18 = sshll.u32 %s1965_s24, 4  ;;  %s1889_s18 = int_to_ptr.vmem [resolvable:$false] %s1888_s18 }
  0x1f   : > { %464 = vxpose.xlu1.b32.cont [2/16] (narrow) %v320_v2, 16  ;;  %v309_v13 = vld [vmem:[%s2064_s15 + $0x30] sm:$0xff]  ;;  %v310_v15 = vld [vmem:[%s2064_s15 + $0x38] sm:$0xff]  ;;  %v311_v17 = vld [vmem:[%s2064_s15 + $0x40] sm:$0xff]  ;;  %p1886_p13 = pnand %p1885_p12, %p2041_p4  ;;  %s1890_s20 = scalar_lea.vmem %s1889_s18, 32 }
  0x20   : > { %432 = vxpose.xlu0.b32.cont [2/16] (narrow) %v304_v3, 16  ;;  %v328_v18 = vld [vmem:[%s2064_s15 + $0xc8] sm:$0xff]  ;;  %v329_v20 = vld [vmem:[%s2064_s15 + $0xd0] sm:$0xff]  ;;  %v330_v22 = vld [vmem:[%s2064_s15 + $0xd8] sm:$0xff]  ;;  %v2138_v3 = vshrl.u32 %v705_v0, 7  ;;  %p1891_p1 = scmp.lt.s32.totalorder %s2723_s13, %s1889_s18  ;;  %p1892_p2 = scmp.lt.s32.totalorder %s1890_s20, %s1884_s17 }
  0x21   : > { %v312_v19 = vld [vmem:[%s2064_s15 + $0x48] sm:$0xff]  ;;  %v313_v21 = vld [vmem:[%s2064_s15 + $0x50] sm:$0xff]  ;;  %v314_v23 = vld [vmem:[%s2064_s15 + $0x58] sm:$0xff]  ;;  %p1887_p0 = pneg %p1886_p13 }
  0x22   : > { %v331_v24 = vld [vmem:[%s2064_s15 + $0xe0] sm:$0xff]  ;;  %v332_v26 = vld [vmem:[%s2064_s15 + $0xe8] sm:$0xff]  ;;  %v333_v28 = vld [vmem:[%s2064_s15 + $0xf0] sm:$0xff]  ;;  %p1893_p3 = por %p1892_p2, %p1891_p1 }
  0x23   : > { %465 = vxpose.xlu1.b32.cont [3/16] (narrow) %v321_v4, 16  ;;  %v315_v25 = vld [vmem:[%s2064_s15 + $0x60] sm:$0xff]  ;;  %v316_v27 = vld [vmem:[%s2064_s15 + $0x68] sm:$0xff]  ;;  %v317_v29 = vld [vmem:[%s2064_s15 + $0x70] sm:$0xff] }
  0x24   : > { %433 = vxpose.xlu0.b32.cont [3/16] (narrow) %v305_v5, 16  ;;  %v334_v30 = vld [vmem:[%s2064_s15 + $0xf8] sm:$0xff]  ;;  %v351_v32 = vld [vmem:[%s2064_s15 + $0x180] sm:$0xff]  ;;  %v352_v34 = vld [vmem:[%s2064_s15 + $0x188] sm:$0xff]  ;;  %p1894_p5 = pnand %p1893_p3, %p1887_p0 }
  0x25   : > { %v318_v31 = vld [vmem:[%s2064_s15 + $0x78] sm:$0xff]  ;;  %v335_v33 = vld [vmem:[%s2064_s15 + $0x100] sm:$0xff]  ;;  %v336_v35 = vld [vmem:[%s2064_s15 + $0x108] sm:$0xff] }
  0x26   : > { %v353_v36 = vld [vmem:[%s2064_s15 + $0x190] sm:$0xff]  ;;  %v354_v38 = vld [vmem:[%s2064_s15 + $0x198] sm:$0xff]  ;;  %v355_v40 = vld [vmem:[%s2064_s15 + $0x1a0] sm:$0xff] }
  0x27   : > { %466 = vxpose.xlu1.b32.cont [4/16] (narrow) %v322_v6, 16  ;;  %v337_v37 = vld [vmem:[%s2064_s15 + $0x110] sm:$0xff]  ;;  %v338_v39 = vld [vmem:[%s2064_s15 + $0x118] sm:$0xff]  ;;  %v339_v41 = vld [vmem:[%s2064_s15 + $0x120] sm:$0xff]  ;;  %v2151_v6 = vsub.s32 1, %v2138_v3 }
  0x28   : > { %434 = vxpose.xlu0.b32.cont [4/16] (narrow) %v306_v7, 16  ;;  %v356_v42 = vld [vmem:[%s2064_s15 + $0x1a8] sm:$0xff]  ;;  %v357_v44 = vld [vmem:[%s2064_s15 + $0x1b0] sm:$0xff]  ;;  %v358_v46 = vld [vmem:[%s2064_s15 + $0x1b8] sm:$0xff] }
  0x29   : > { %v340_v43 = vld [vmem:[%s2064_s15 + $0x128] sm:$0xff]  ;;  %v341_v45 = vld [vmem:[%s2064_s15 + $0x130] sm:$0xff]  ;;  %v342_v47 = vld [vmem:[%s2064_s15 + $0x138] sm:$0xff] }
  0x2a   : > { %v359_v48 = vld [vmem:[%s2064_s15 + $0x1c0] sm:$0xff]  ;;  %v360_v50 = vld [vmem:[%s2064_s15 + $0x1c8] sm:$0xff]  ;;  %v361_v52 = vld [vmem:[%s2064_s15 + $0x1d0] sm:$0xff] }
  0x2b   : > { %467 = vxpose.xlu1.b32.cont [5/16] (narrow) %v323_v8, 16  ;;  %v343_v49 = vld [vmem:[%s2064_s15 + $0x140] sm:$0xff]  ;;  %v344_v51 = vld [vmem:[%s2064_s15 + $0x148] sm:$0xff]  ;;  %v345_v53 = vld [vmem:[%s2064_s15 + $0x150] sm:$0xff]  ;;  %v2154_v8 = vsub.s32 0, %v2138_v3 }
  0x2c   : > { %435 = vxpose.xlu0.b32.cont [5/16] (narrow) %v307_v9, 16  ;;  %v362_v54 = vld [vmem:[%s2064_s15 + $0x1d8] sm:$0xff]  ;;  %v363_v56 = vld [vmem:[%s2064_s15 + $0x1e0] sm:$0xff]  ;;  %v364_v58 = vld [vmem:[%s2064_s15 + $0x1e8] sm:$0xff] }
  0x2d   : > { %v346_v55 = vld [vmem:[%s2064_s15 + $0x158] sm:$0xff]  ;;  %v347_v57 = vld [vmem:[%s2064_s15 + $0x160] sm:$0xff]  ;;  %v348_v59 = vld [vmem:[%s2064_s15 + $0x168] sm:$0xff] }
  0x2e   : > { %v365_v60 = vld [vmem:[%s2064_s15 + $0x1f0] sm:$0xff]  ;;  %v366_v62 = vld [vmem:[%s2064_s15 + $0x1f8] sm:$0xff]  ;;  %v383_v1 = vld [vmem:[%s2064_s15 + $0x280] sm:$0xff] }
  0x2f   : > { %468 = vxpose.xlu1.b32.cont [6/16] (narrow) %v324_v10, 16  ;;  %v349_v61 = vld [vmem:[%s2064_s15 + $0x170] sm:$0xff]  ;;  %v350_v63 = vld [vmem:[%s2064_s15 + $0x178] sm:$0xff]  ;;  %v367_v2 = vld [vmem:[%s2064_s15 + $0x200] sm:$0xff] }
  0x30   : > { %436 = vxpose.xlu0.b32.cont [6/16] (narrow) %v308_v11, 16  ;;  %v2143_v4 = vld [vmem:[%s2769_s1] sm:$0xff]  ;;  %v384_v10 = vld [vmem:[%s2064_s15 + $0x288] sm:$0xff]  ;;  %v378_v0 = vld [vmem:[%s2064_s15 + $0x258] sm:$0xff] }
  0x31   : > { %v2148_v5 = vld [vmem:[%s2770_s2] sm:$0xff]  ;;  %v368_v11 = vld [vmem:[%s2064_s15 + $0x208] sm:$0xff] }
  0x33   : > { %469 = vxpose.xlu1.b32.cont [7/16] (narrow) %v325_v12, 16  ;;  %v712_v12 = vrot.slane %v2143_v4, %v2151_v6 }
  0x34   : > { %437 = vxpose.xlu0.b32.cont [7/16] (narrow) %v309_v13, 16  ;;  %v770_v13 = vrot.slane %v2148_v5, %v2151_v6 }
  0x37   : > { %470 = vxpose.xlu1.b32.cont [8/16] (narrow) %v326_v14, 16  ;;  %v708_v14 = vrot.slane %v2143_v4, %v2154_v8 }
  0x38   : > { %438 = vxpose.xlu0.b32.cont [8/16] (narrow) %v310_v15, 16  ;;  %v766_v15 = vrot.slane %v2148_v5, %v2154_v8 }
  0x3b   : > { %471 = vxpose.xlu1.b32.cont [9/16] (narrow) %v327_v16, 16 }
  0x3c   : > { %439 = vxpose.xlu0.b32.cont [9/16] (narrow) %v311_v17, 16 }
  0x3f   : > { %472 = vxpose.xlu1.b32.cont [10/16] (narrow) %v328_v18, 16 }
  0x40   : > { %440 = vxpose.xlu0.b32.cont [10/16] (narrow) %v312_v19, 16 }
  0x43   : > { %473 = vxpose.xlu1.b32.cont [11/16] (narrow) %v329_v20, 16  ;;  %v385_v20 = vld [vmem:[%s2064_s15 + $0x290] sm:$0xff] }
  0x44   : > { %441 = vxpose.xlu0.b32.cont [11/16] (narrow) %v313_v21, 16  ;;  %v369_v21 = vld [vmem:[%s2064_s15 + $0x210] sm:$0xff] }
  0x47   : > { %474 = vxpose.xlu1.b32.cont [12/16] (narrow) %v330_v22, 16 }
  0x48   : > { %442 = vxpose.xlu0.b32.cont [12/16] (narrow) %v314_v23, 16 }
  0x4b   : > { %475 = vxpose.xlu1.b32.cont [13/16] (narrow) %v331_v24, 16 }
  0x4c   : > { %443 = vxpose.xlu0.b32.cont [13/16] (narrow) %v315_v25, 16 }
  0x4f   : > { %476 = vxpose.xlu1.b32.cont [14/16] (narrow) %v332_v26, 16 }
  0x50   : > { %444 = vxpose.xlu0.b32.cont [14/16] (narrow) %v316_v27, 16 }
  0x53   : > { %477 = vxpose.xlu1.b32.cont [15/16] (narrow) %v333_v28, 16 }
  0x54   : > { %445 = vxpose.xlu0.b32.cont [15/16] (narrow) %v317_v29, 16 }
  0x57   : > { %478 = vxpose.xlu1.b32.end [16/16] (narrow) %v334_v30, 16  ;;  %v386_v30 = vld [vmem:[%s2064_s15 + $0x298] sm:$0xff] }
  0x58   : > { %446 = vxpose.xlu0.b32.end [16/16] (narrow) %v318_v31, 16  ;;  %v370_v31 = vld [vmem:[%s2064_s15 + $0x218] sm:$0xff] }
  0x5b   : > { %527 = vxpose.xlu1.b32.start [1/16] (narrow) %v351_v32, 16 }
  0x5c   : > { %495 = vxpose.xlu0.b32.start [1/16] (narrow) %v335_v33, 16 }
  0x5f   : > { %528 = vxpose.xlu1.b32.cont [2/16] (narrow) %v352_v34, 16 }
  0x60   : > { %496 = vxpose.xlu0.b32.cont [2/16] (narrow) %v336_v35, 16 }
  0x63   : > { %529 = vxpose.xlu1.b32.cont [3/16] (narrow) %v353_v36, 16  ;;  %v387_v36 = vld [vmem:[%s2064_s15 + $0x2a0] sm:$0xff] }
  0x64   : > { %497 = vxpose.xlu0.b32.cont [3/16] (narrow) %v337_v37, 16  ;;  %v371_v37 = vld [vmem:[%s2064_s15 + $0x220] sm:$0xff] }
  0x67   : > { %530 = vxpose.xlu1.b32.cont [4/16] (narrow) %v354_v38, 16 }
  0x68   : > { %498 = vxpose.xlu0.b32.cont [4/16] (narrow) %v338_v39, 16 }
  0x6b   : > { %531 = vxpose.xlu1.b32.cont [5/16] (narrow) %v355_v40, 16 }
  0x6c   : > { %499 = vxpose.xlu0.b32.cont [5/16] (narrow) %v339_v41, 16 }
  0x6f   : > { %532 = vxpose.xlu1.b32.cont [6/16] (narrow) %v356_v42, 16  ;;  %v388_v42 = vld [vmem:[%s2064_s15 + $0x2a8] sm:$0xff] }
  0x70   : > { %500 = vxpose.xlu0.b32.cont [6/16] (narrow) %v340_v43, 16  ;;  %v372_v43 = vld [vmem:[%s2064_s15 + $0x228] sm:$0xff] }
  0x73   : > { %533 = vxpose.xlu1.b32.cont [7/16] (narrow) %v357_v44, 16 }
  0x74   : > { %501 = vxpose.xlu0.b32.cont [7/16] (narrow) %v341_v45, 16 }
  0x77   : > { %534 = vxpose.xlu1.b32.cont [8/16] (narrow) %v358_v46, 16 }
  0x78   : > { %502 = vxpose.xlu0.b32.cont [8/16] (narrow) %v342_v47, 16 }
  0x7b   : > { %535 = vxpose.xlu1.b32.cont [9/16] (narrow) %v359_v48, 16  ;;  %v389_v48 = vld [vmem:[%s2064_s15 + $0x2b0] sm:$0xff] }
  0x7c   : > { %503 = vxpose.xlu0.b32.cont [9/16] (narrow) %v343_v49, 16  ;;  %v373_v49 = vld [vmem:[%s2064_s15 + $0x230] sm:$0xff] }
  0x7f   : > { %536 = vxpose.xlu1.b32.cont [10/16] (narrow) %v360_v50, 16 }
  0x80   : > { %504 = vxpose.xlu0.b32.cont [10/16] (narrow) %v344_v51, 16 }
  0x83   : > { %537 = vxpose.xlu1.b32.cont [11/16] (narrow) %v361_v52, 16 }
  0x84   : > { %505 = vxpose.xlu0.b32.cont [11/16] (narrow) %v345_v53, 16 }
  0x87   : > { %538 = vxpose.xlu1.b32.cont [12/16] (narrow) %v362_v54, 16  ;;  %v390_v54 = vld [vmem:[%s2064_s15 + $0x2b8] sm:$0xff] }
  0x88   : > { %506 = vxpose.xlu0.b32.cont [12/16] (narrow) %v346_v55, 16  ;;  %v374_v55 = vld [vmem:[%s2064_s15 + $0x238] sm:$0xff] }
  0x8b   : > { %539 = vxpose.xlu1.b32.cont [13/16] (narrow) %v363_v56, 16 }
  0x8c   : > { %507 = vxpose.xlu0.b32.cont [13/16] (narrow) %v347_v57, 16  ;;  %v391_v57 = vld [vmem:[%s2064_s15 + $0x2c0] sm:$0xff] }
  0x8f   : > { %540 = vxpose.xlu1.b32.cont [14/16] (narrow) %v364_v58, 16  ;;  %v375_v58 = vld [vmem:[%s2064_s15 + $0x240] sm:$0xff] }
  0x90   : > { %508 = vxpose.xlu0.b32.cont [14/16] (narrow) %v348_v59, 16  ;;  %v392_v59 = vld [vmem:[%s2064_s15 + $0x2c8] sm:$0xff] }
  0x93   : > { %541 = vxpose.xlu1.b32.cont [15/16] (narrow) %v365_v60, 16  ;;  %v376_v60 = vld [vmem:[%s2064_s15 + $0x248] sm:$0xff] }
  0x94   : > { %509 = vxpose.xlu0.b32.cont [15/16] (narrow) %v349_v61, 16  ;;  %v393_v61 = vld [vmem:[%s2064_s15 + $0x2d0] sm:$0xff] }
  0x97   : > { %542 = vxpose.xlu1.b32.end [16/16] (narrow) %v366_v62, 16  ;;  %v377_v62 = vld [vmem:[%s2064_s15 + $0x250] sm:$0xff] }
  0x98   : > { %510 = vxpose.xlu0.b32.end [16/16] (narrow) %v350_v63, 16  ;;  %v394_v63 = vld [vmem:[%s2064_s15 + $0x2d8] sm:$0xff] }
  0x9b   : > { %591 = vxpose.xlu1.b32.start [1/16] (narrow) %v383_v1, 16  ;;  %v479_v7 = vpop.trf.xlu1  ;;  %v395_v1 = vld [vmem:[%s2064_s15 + $0x2e0] sm:$0xff] }
  0x9c   : > { %559 = vxpose.xlu0.b32.start [1/16] (narrow) %v367_v2, 16  ;;  %v447_v9 = vpop.trf.xlu0  ;;  %688 = vst [vmem:[%s2136_s19 + $0x8] sm:$0xff] %v479_v7  ;;  %v746_v16 = vmul.f32 %v712_v12, %v479_v7  ;;  %v379_v2 = vld [vmem:[%s2064_s15 + $0x260] sm:$0xff]  ;;  %v396_v7 = vld [vmem:[%s2064_s15 + $0x2e8] sm:$0xff] }
  0x9d   : > { %687 = vst [vmem:[%s2136_s19] sm:$0xff] %v447_v9  ;;  %v745_v17 = vmul.f32 %v708_v14, %v447_v9  ;;  %v380_v9 = vld [vmem:[%s2064_s15 + $0x268] sm:$0xff] }
  0x9e   : > { %v804_v24 = vadd.f32 %v770_v13, %v746_v16  ;;  %v415_v16 = vld [vmem:[%s2064_s15 + $0x380] sm:$0xff] }
  0x9f   : > { %592 = vxpose.xlu1.b32.cont [2/16] (narrow) %v384_v10, 16  ;;  %v480_v18 = vpop.trf.xlu1  ;;  %v803_v25 = vadd.f32 %v766_v15, %v745_v17  ;;  %v397_v10 = vld [vmem:[%s2064_s15 + $0x2f0] sm:$0xff]  ;;  %v399_v17 = vld [vmem:[%s2064_s15 + $0x300] sm:$0xff] }
  0xa0   : > { %560 = vxpose.xlu0.b32.cont [2/16] (narrow) %v368_v11, 16  ;;  %v448_v19 = vpop.trf.xlu0  ;;  %696 = vst [vmem:[%s2136_s19 + $0x48] sm:$0xff] %v480_v18  ;;  %v754_v22 = vmul.f32 %v712_v12, %v480_v18  ;;  %v820_v28 = vmax.f32 %v804_v24, 0.0  ;;  %v381_v11 = vld [vmem:[%s2064_s15 + $0x270] sm:$0xff]  ;;  %v398_v12 = vld [vmem:[%s2064_s15 + $0x2f8] sm:$0xff]  ;;  %v416_v24 = vld [vmem:[%s2064_s15 + $0x388] sm:$0xff] }
  0xa1   : > { %695 = vst [vmem:[%s2136_s19 + $0x40] sm:$0xff] %v448_v19  ;;  %v753_v23 = vmul.f32 %v708_v14, %v448_v19  ;;  %v819_v29 = vmax.f32 %v803_v25, 0.0  ;;  %v2205_v14 = vsub.s32 3, %v2138_v3  ;;  %v400_v25 = vld [vmem:[%s2064_s15 + $0x308] sm:$0xff] }
  0xa2   : > { %v812_v26 = vadd.f32 %v770_v13, %v754_v22  ;;  %v382_v13 = vld [vmem:[%s2064_s15 + $0x278] sm:$0xff] }
  0xa3   : > { %v811_v27 = vadd.f32 %v766_v15, %v753_v23  ;;  %593 = vxpose.xlu1.b32.cont [3/16] (narrow) %v385_v20, 16  ;;  %v2208_v15 = vsub.s32 2, %v2138_v3  ;;  %v720_v18 = vrot.slane %v2143_v4, %v2205_v14  ;;  %v778_v20 = vrot.slane %v2148_v5, %v2205_v14 }
  0xa4   : > { %561 = vxpose.xlu0.b32.cont [3/16] (narrow) %v369_v21, 16  ;;  %v828_v32 = vmax.f32 %v812_v26, 0.0 }
  0xa5   : > { %v827_v33 = vmax.f32 %v811_v27, 0.0  ;;  %v716_v19 = vrot.slane %v2143_v4, %v2208_v15  ;;  %v774_v21 = vrot.slane %v2148_v5, %v2208_v15 }
  0xa6   : > { %v843_v34 = vadd.f32 %v828_v32, %v820_v28  ;;  %v417_v28 = vld [vmem:[%s2064_s15 + $0x390] sm:$0xff] }
  0xa7   : > { %v836_v35 = vadd.f32 %v827_v33, %v819_v29  ;;  %594 = vxpose.xlu1.b32.cont [4/16] (narrow) %v386_v30, 16  ;;  %v401_v29 = vld [vmem:[%s2064_s15 + $0x310] sm:$0xff] }
  0xa8   : > { %562 = vxpose.xlu0.b32.cont [4/16] (narrow) %v370_v31, 16  ;;  %v844_v38 = vrot.slane %v843_v34, 4 }
  0xa9   : > { %v837_v39 = vrot.slane %v836_v35, 4 }
  0xaa   : > { %v845_v40 = vadd.f32 %v844_v38, %v843_v34  ;;  %v973_v34 = vld [vmem:[%s2771_s3 + $0x80] sm:$0xff] }
  0xab   : > { %v838_v41 = vadd.f32 %v837_v39, %v836_v35  ;;  %595 = vxpose.xlu1.b32.cont [5/16] (narrow) %v387_v36, 16  ;;  %v974_v35 = vld [vmem:[%s2771_s3 + $0x88] sm:$0xff]  ;;  %v1005_v36 = vld [vmem:[%s2771_s3 + $0x180] sm:$0xff] }
  0xac   : > { %563 = vxpose.xlu0.b32.cont [5/16] (narrow) %v371_v37, 16  ;;  %v846_v44 = vrot.slane %v845_v40, 2  ;;  %v1006_v39 = vld [vmem:[%s2771_s3 + $0x188] sm:$0xff] }
  0xad   : > { %v839_v45 = vrot.slane %v838_v41, 2 }
  0xae   : > { %v847_v46 = vadd.f32 %v846_v44, %v845_v40  ;;  %v957_v40 = vld [vmem:[%s2771_s3] sm:$0xff]  ;;  %v1732_v44 = vpack.c.bf16 %v1006_v39, %v1005_v36  ;;  %v980_v39 = vld [vmem:[%s2771_s3 + $0xb8] sm:$0xff] }
  0xaf   : > { %v840_v47 = vadd.f32 %v839_v45, %v838_v41  ;;  %596 = vxpose.xlu1.b32.cont [6/16] (narrow) %v388_v42, 16  ;;  %v958_v41 = vld [vmem:[%s2771_s3 + $0x8] sm:$0xff] }
  0xb0   : > { %564 = vxpose.xlu0.b32.cont [6/16] (narrow) %v372_v43, 16  ;;  %v848_v50 = vrot.slane %v847_v46, 1  ;;  %v1700_v43 = vpack.c.bf16 %v974_v35, %v973_v34  ;;  %v1702_v45 = vpack.c.bf16 %v958_v41, %v957_v40  ;;  %1733 = vmatprep.subr.bf16.mxu1 %v1732_v44  ;;  %v404_v34 = vld [vmem:[%s2064_s15 + $0x328] sm:$0xff]  ;;  %v1011_v40 = vld [vmem:[%s2771_s3 + $0x1b0] sm:$0xff] }
  0xb1   : > { %v841_v51 = vrot.slane %v840_v47, 1 }
  0xb2   : > { %v2180_v52 = vadd.f32 %v848_v50, %v847_v46  ;;  %v989_v46 = vld [vmem:[%s2771_s3 + $0x100] sm:$0xff]  ;;  %1701 = vmatprep.subr.bf16.mxu0 %v1700_v43 }
  0xb3   : > { %v2182_v53 = vadd.f32 %v841_v51, %v840_v47  ;;  %597 = vxpose.xlu1.b32.cont [7/16] (narrow) %v389_v48, 16  ;;  %v990_v47 = vld [vmem:[%s2771_s3 + $0x108] sm:$0xff]  ;;  %v418_v48 = vld [vmem:[%s2064_s15 + $0x398] sm:$0xff]  ;;  %1703 = vmatpush3.bf16.msra.mxu0 %v1702_v45 }
  0xb4   : > { %565 = vxpose.xlu0.b32.cont [7/16] (narrow) %v373_v49, 16  ;;  %v402_v49 = vld [vmem:[%s2064_s15 + $0x318] sm:$0xff] }
  0xb5   : > { %v900_v56 = vcombine.low %v2182_v53, %v2180_v52  ;;  %v1012_v45 = vld [vmem:[%s2771_s3 + $0x1b8] sm:$0xff] }
  0xb7   : > { %598 = vxpose.xlu1.b32.cont [8/16] (narrow) %v390_v54, 16 }
  0xb8   : > { %566 = vxpose.xlu0.b32.cont [8/16] (narrow) %v374_v55, 16  ;;  %v1734_v55 = vpack.c.bf16 %v990_v47, %v989_v46  ;;  %v963_v46 = vld [vmem:[%s2771_s3 + $0x30] sm:$0xff]  ;;  %v964_v47 = vld [vmem:[%s2771_s3 + $0x38] sm:$0xff] }
  0xba   : > { %1735 = vmatpush3.bf16.msra.mxu1 %v1734_v55  ;;  %v405_v55 = vld [vmem:[%s2064_s15 + $0x330] sm:$0xff] }
  0xbb   : > { %599 = vxpose.xlu1.b32.cont [9/16] (narrow) %v391_v57, 16  ;;  %v975_v57 = vld [vmem:[%s2771_s3 + $0x90] sm:$0xff] }
  0xbc   : > { %567 = vxpose.xlu0.b32.cont [9/16] (narrow) %v375_v58, 16  ;;  %v976_v58 = vld [vmem:[%s2771_s3 + $0x98] sm:$0xff] }
  0xbf   : > { %600 = vxpose.xlu1.b32.cont [10/16] (narrow) %v392_v59, 16  ;;  %v1007_v59 = vld [vmem:[%s2771_s3 + $0x190] sm:$0xff] }
  0xc0   : > { %568 = vxpose.xlu0.b32.cont [10/16] (narrow) %v376_v60, 16 }
  0xc3   : > { %601 = vxpose.xlu1.b32.cont [11/16] (narrow) %v393_v61, 16 }
  0xc4   : > { %569 = vxpose.xlu0.b32.cont [11/16] (narrow) %v377_v62, 16  ;;  %v1704_v62 = vpack.c.bf16 %v976_v58, %v975_v57 }
  0xc6   : > { %1705 = vmatprep.subr.bf16.mxu0 %v1704_v62  ;;  %v1013_v62 = vld [vmem:[%s2771_s3 + $0x1c0] sm:$0xff] }
  0xc7   : > { %602 = vxpose.xlu1.b32.cont [12/16] (narrow) %v394_v63, 16  ;;  %v1008_v63 = vld [vmem:[%s2771_s3 + $0x198] sm:$0xff] }
  0xc8   : > { %570 = vxpose.xlu0.b32.cont [12/16] (narrow) %v378_v0, 16  ;;  %v959_v0 = vld [vmem:[%s2771_s3 + $0x10] sm:$0xff] }
  0xcb   : > { %603 = vxpose.xlu1.b32.cont [13/16] (narrow) %v395_v1, 16  ;;  %v960_v1 = vld [vmem:[%s2771_s3 + $0x18] sm:$0xff] }
  0xcc   : > { %571 = vxpose.xlu0.b32.cont [13/16] (narrow) %v379_v2, 16  ;;  %v1736_v2 = vpack.c.bf16 %v1008_v63, %v1007_v59 }
  0xce   : > { %1737 = vmatprep.subr.bf16.mxu1 %v1736_v2 }
  0xcf   : > { %604 = vxpose.xlu1.b32.cont [14/16] (narrow) %v396_v7, 16  ;;  %v1706_v7 = vpack.c.bf16 %v960_v1, %v959_v0 }
  0xd0   : > { %572 = vxpose.xlu0.b32.cont [14/16] (narrow) %v380_v9, 16  ;;  %v991_v9 = vld [vmem:[%s2771_s3 + $0x110] sm:$0xff] }
  0xd1   : > { %1707 = vmatpush3.bf16.msra.mxu0 %v1706_v7  ;;  %v1014_v7 = vld [vmem:[%s2771_s3 + $0x1c8] sm:$0xff] }
  0xd3   : > { %605 = vxpose.xlu1.b32.cont [15/16] (narrow) %v397_v10, 16  ;;  %v992_v10 = vld [vmem:[%s2771_s3 + $0x118] sm:$0xff] }
  0xd4   : > { %573 = vxpose.xlu0.b32.cont [15/16] (narrow) %v381_v11, 16  ;;  %v419_v11 = vld [vmem:[%s2064_s15 + $0x3a0] sm:$0xff] }
  0xd7   : > { %606 = vxpose.xlu1.b32.end [16/16] (narrow) %v398_v12, 16  ;;  %v403_v12 = vld [vmem:[%s2064_s15 + $0x320] sm:$0xff] }
  0xd8   : > { %574 = vxpose.xlu0.b32.end [16/16] (narrow) %v382_v13, 16 }
  0xdb   : > { %655 = vxpose.xlu1.b32.start [1/16] (narrow) %v415_v16, 16  ;;  %v543_v22 = vpop.trf.xlu1 }
  0xdc   : > { %623 = vxpose.xlu0.b32.start [1/16] (narrow) %v399_v17, 16  ;;  %v511_v23 = vpop.trf.xlu0  ;;  %690 = vst [vmem:[%s2136_s19 + $0x18] sm:$0xff] %v543_v22  ;;  %v748_v26 = vmul.f32 %v720_v18, %v543_v22  ;;  %v1738_v17 = vpack.c.bf16 %v992_v10, %v991_v9  ;;  %v965_v9 = vld [vmem:[%s2771_s3 + $0x40] sm:$0xff]  ;;  %v966_v10 = vld [vmem:[%s2771_s3 + $0x48] sm:$0xff] }
  0xdd   : > { %689 = vst [vmem:[%s2136_s19 + $0x10] sm:$0xff] %v511_v23  ;;  %v747_v27 = vmul.f32 %v716_v19, %v511_v23 }
  0xde   : > { %v806_v30 = vadd.f32 %v778_v20, %v748_v26  ;;  %v1010_v26 = vld [vmem:[%s2771_s3 + $0x1a8] sm:$0xff]  ;;  %1739 = vmatpush3.bf16.msra.mxu1 %v1738_v17  ;;  %v422_v17 = vld [vmem:[%s2064_s15 + $0x3b8] sm:$0xff] }
  0xdf   : > { %v805_v31 = vadd.f32 %v774_v21, %v747_v27  ;;  %656 = vxpose.xlu1.b32.cont [2/16] (narrow) %v416_v24, 16  ;;  %v544_v32 = vpop.trf.xlu1  ;;  %v961_v27 = vld [vmem:[%s2771_s3 + $0x20] sm:$0xff] }
  0xe0   : > { %624 = vxpose.xlu0.b32.cont [2/16] (narrow) %v400_v25, 16  ;;  %v512_v33 = vpop.trf.xlu0  ;;  %698 = vst [vmem:[%s2136_s19 + $0x58] sm:$0xff] %v544_v32  ;;  %v756_v37 = vmul.f32 %v720_v18, %v544_v32  ;;  %v822_v42 = vmax.f32 %v806_v30, 0.0  ;;  %v977_v18 = vld [vmem:[%s2771_s3 + $0xa0] sm:$0xff]  ;;  %v994_v32 = vld [vmem:[%s2771_s3 + $0x128] sm:$0xff] }
  0xe1   : > { %697 = vst [vmem:[%s2136_s19 + $0x50] sm:$0xff] %v512_v33  ;;  %v755_v38 = vmul.f32 %v716_v19, %v512_v33  ;;  %v821_v50 = vmax.f32 %v805_v31, 0.0  ;;  %v978_v19 = vld [vmem:[%s2771_s3 + $0xa8] sm:$0xff]  ;;  %v993_v31 = vld [vmem:[%s2771_s3 + $0x120] sm:$0xff] }
  0xe2   : > { %v814_v51 = vadd.f32 %v778_v20, %v756_v37  ;;  %v1009_v20 = vld [vmem:[%s2771_s3 + $0x1a0] sm:$0xff]  ;;  %v1708_v25 = vpack.c.bf16 %v978_v19, %v977_v18  ;;  %v420_v33 = vld [vmem:[%s2064_s15 + $0x3a8] sm:$0xff]  ;;  %v1742_v37 = vpack.c.bf16 %v994_v32, %v993_v31  ;;  %v406_v18 = vld [vmem:[%s2064_s15 + $0x338] sm:$0xff] }
  0xe3   : > { %v813_v54 = vadd.f32 %v774_v21, %v755_v38  ;;  %657 = vxpose.xlu1.b32.cont [3/16] (narrow) %v417_v28, 16  ;;  %v1964_v21 = vmov 1966171168   ;;  %v962_v28 = vld [vmem:[%s2771_s3 + $0x28] sm:$0xff]  ;;  %v979_v38 = vld [vmem:[%s2771_s3 + $0xb0] sm:$0xff]  ;;  %v1000_v31 = vld [vmem:[%s2771_s3 + $0x158] sm:$0xff] }
  0xe4   : > { %625 = vxpose.xlu0.b32.cont [3/16] (narrow) %v401_v29, 16  ;;  %v830_v60 = vmax.f32 %v814_v51, 0.0  ;;  %v905_v22 = vunpack.c.l.s4 %v1964_v21  ;;  %v1740_v29 = vpack.c.bf16 %v1010_v26, %v1009_v20  ;;  %v1710_v30 = vpack.c.bf16 %v962_v28, %v961_v27  ;;  %1709 = vmatprep.subr.bf16.mxu0 %v1708_v25  ;;  %v996_v51 = vld [vmem:[%s2771_s3 + $0x138] sm:$0xff]  ;;  %v423_v32 = vld [vmem:[%s2064_s15 + $0x3c0] sm:$0xff] }
  0xe5   : > { %v829_v61 = vmax.f32 %v813_v54, 0.0  ;;  %v1712_v44 = vpack.c.bf16 %v980_v39, %v979_v38  ;;  %v421_v54 = vld [vmem:[%s2064_s15 + $0x3b0] sm:$0xff]  ;;  %v1016_v28 = vld [vmem:[%s2771_s3 + $0x1d8] sm:$0xff]  ;;  %v1017_v38 = vld [vmem:[%s2771_s3 + $0x1e0] sm:$0xff] }
  0xe6   : > { %v857_v13 = vadd.f32 %v830_v60, %v822_v42  ;;  %v906_v41 = vunpack.c.0.s8 %v905_v22  ;;  %1741 = vmatprep.subr.bf16.mxu1 %v1740_v29  ;;  %1711 = vmatpush3.bf16.msra.mxu0 %v1710_v30  ;;  %v981_v60 = vld [vmem:[%s2771_s3 + $0xc0] sm:$0xff]  ;;  %v983_v22 = vld [vmem:[%s2771_s3 + $0xd0] sm:$0xff]  ;;  %v968_v30 = vld [vmem:[%s2771_s3 + $0x58] sm:$0xff] }
  0xe7   : > { %v850_v16 = vadd.f32 %v829_v61, %v821_v50  ;;  %658 = vxpose.xlu1.b32.cont [4/16] (narrow) %v418_v48, 16  ;;  %1743 = vmatpush3.bf16.msra.mxu1 %v1742_v37  ;;  %v1744_v48 = vpack.c.bf16 %v1012_v45, %v1011_v40  ;;  %v995_v50 = vld [vmem:[%s2771_s3 + $0x130] sm:$0xff]  ;;  %v982_v61 = vld [vmem:[%s2771_s3 + $0xc8] sm:$0xff] }
  0xe8   : > { %626 = vxpose.xlu0.b32.cont [4/16] (narrow) %v402_v49, 16  ;;  %v858_v23 = vrot.slane %v857_v13, 4  ;;  %v1714_v49 = vpack.c.bf16 %v964_v47, %v963_v46  ;;  %1713 = vmatprep.subr.bf16.mxu0 %v1712_v44  ;;  %v1746_v59 = vpack.c.bf16 %v996_v51, %v995_v50  ;;  %v2342_v63 = vsub.s32 %v906_v41, %v2138_v3  ;;  %v967_v29 = vld [vmem:[%s2771_s3 + $0x50] sm:$0xff]  ;;  %v986_v37 = vld [vmem:[%s2771_s3 + $0xe8] sm:$0xff]  ;;  %v1001_v46 = vld [vmem:[%s2771_s3 + $0x160] sm:$0xff] }
  0xe9   : > { %v851_v24 = vrot.slane %v850_v16, 4  ;;  %1745 = vmatprep.subr.bf16.mxu1 %v1744_v48  ;;  %v1716_v2 = vpack.c.bf16 %v982_v61, %v981_v60  ;;  %v1722_v53 = vpack.c.bf16 %v968_v30, %v967_v29  ;;  %v1018_v41 = vld [vmem:[%s2771_s3 + $0x1e8] sm:$0xff]  ;;  %v987_v51 = vld [vmem:[%s2771_s3 + $0xf0] sm:$0xff]  ;;  %v972_v60 = vld [vmem:[%s2771_s3 + $0x78] sm:$0xff]  ;;  %v2473_v29 = vsub.s32 5, %v2138_v3 }
  0xea   : > { %v859_v35 = vadd.f32 %v858_v23, %v857_v13  ;;  %1715 = vmatpush3.bf16.msra.mxu0 %v1714_v49  ;;  %v997_v13 = vld [vmem:[%s2771_s3 + $0x140] sm:$0xff]  ;;  %v984_v23 = vld [vmem:[%s2771_s3 + $0xd8] sm:$0xff]  ;;  %v2374_v25 = vrot.slane %v900_v56, %v2342_v63  ;;  %v999_v56 = vld [vmem:[%s2771_s3 + $0x150] sm:$0xff]  ;;  %v1756_v44 = vpack.c.bf16 %v1018_v41, %v1017_v38  ;;  %v2476_v30 = vsub.s32 4, %v2138_v3 }
  0xeb   : > { %v852_v36 = vadd.f32 %v851_v24, %v850_v16  ;;  %659 = vxpose.xlu1.b32.cont [5/16] (narrow) %v419_v11, 16  ;;  %1747 = vmatpush3.bf16.msra.mxu1 %v1746_v59  ;;  %v1748_v11 = vpack.c.bf16 %v1014_v7, %v1013_v62  ;;  %v998_v16 = vld [vmem:[%s2771_s3 + $0x148] sm:$0xff]  ;;  %v1015_v24 = vld [vmem:[%s2771_s3 + $0x1d0] sm:$0xff]  ;;  %v1720_v27 = vpack.c.bf16 %v984_v23, %v983_v22  ;;  %v1037_v7 = vld [vmem:[%s2771_s3 + $0x280] sm:$0xff] }
  0xec   : > { %627 = vxpose.xlu0.b32.cont [5/16] (narrow) %v403_v12, 16  ;;  %v860_v42 = vrot.slane %v859_v35, 2  ;;  %v1718_v12 = vpack.c.bf16 %v966_v10, %v965_v9  ;;  %1717 = vmatprep.subr.bf16.mxu0 %v1716_v2  ;;  %v1750_v21 = vpack.c.bf16 %v998_v16, %v997_v13  ;;  %v1752_v52 = vpack.c.bf16 %v1016_v28, %v1015_v24  ;;  %v1002_v47 = vld [vmem:[%s2771_s3 + $0x168] sm:$0xff]  ;;  %v971_v59 = vld [vmem:[%s2771_s3 + $0x70] sm:$0xff]  ;;  %v1069_v10 = vld [vmem:[%s2771_s3 + $0x380] sm:$0xff] }
  0xed   : > { %v853_v43 = vrot.slane %v852_v36, 2  ;;  %1749 = vmatprep.subr.bf16.mxu1 %v1748_v11  ;;  %v424_v48 = vld [vmem:[%s2064_s15 + $0x3c8] sm:$0xff]  ;;  %v1758_v50 = vpack.c.bf16 %v1002_v47, %v1001_v46  ;;  %v1730_v62 = vpack.c.bf16 %v972_v60, %v971_v59  ;;  %v425_v11 = vld [vmem:[%s2064_s15 + $0x3d0] sm:$0xff]  ;;  %v414_v28 = vld [vmem:[%s2064_s15 + $0x378] sm:$0xff] }
  0xee   : > { %v861_v57 = vadd.f32 %v860_v42, %v859_v35  ;;  %1719 = vmatpush3.bf16.msra.mxu0 %v1718_v12  ;;  %v1754_v35 = vpack.c.bf16 %v1000_v31, %v999_v56  ;;  %v969_v42 = vld [vmem:[%s2771_s3 + $0x60] sm:$0xff]  ;;  %v408_v49 = vld [vmem:[%s2064_s15 + $0x348] sm:$0xff]  ;;  %v409_v12 = vld [vmem:[%s2064_s15 + $0x350] sm:$0xff]  ;;  %v786_v56 = vrot.slane %v2148_v5, %v2473_v29  ;;  %v782_v31 = vrot.slane %v2148_v5, %v2476_v30 }
  0xef   : > { %v854_v58 = vadd.f32 %v853_v43, %v852_v36  ;;  %660 = vxpose.xlu1.b32.cont [6/16] (narrow) %v420_v33, 16  ;;  %1751 = vmatpush3.bf16.msra.mxu1 %v1750_v21  ;;  %v407_v33 = vld [vmem:[%s2064_s15 + $0x340] sm:$0xff]  ;;  %v970_v43 = vld [vmem:[%s2771_s3 + $0x68] sm:$0xff]  ;;  %v429_v24 = vld [vmem:[%s2064_s15 + $0x3f0] sm:$0xff] }
  0xf0   : > { %628 = vxpose.xlu0.b32.cont [6/16] (narrow) %v404_v34, 16  ;;  %v862_v0 = vrot.slane %v861_v57, 1  ;;  %1721 = vmatprep.subr.bf16.mxu0 %v1720_v27  ;;  %v985_v36 = vld [vmem:[%s2771_s3 + $0xe0] sm:$0xff]  ;;  %v1726_v45 = vpack.c.bf16 %v970_v43, %v969_v42  ;;  %v1038_v9 = vld [vmem:[%s2771_s3 + $0x288] sm:$0xff]  ;;  %v430_v27 = vld [vmem:[%s2064_s15 + $0x3f8] sm:$0xff] }
  0xf1   : > { %v855_v1 = vrot.slane %v854_v58, 1  ;;  %1753 = vmatprep.subr.bf16.mxu1 %v1752_v52  ;;  %v1724_v40 = vpack.c.bf16 %v986_v37, %v985_v36  ;;  %v1764_v13 = vpack.c.bf16 %v1038_v9, %v1037_v7  ;;  %v1070_v16 = vld [vmem:[%s2771_s3 + $0x388] sm:$0xff]  ;;  %v411_v21 = vld [vmem:[%s2064_s15 + $0x360] sm:$0xff]  ;;  %v728_v52 = vrot.slane %v2143_v4, %v2473_v29 }
  0xf2   : > { %v863_v19 = vadd.f32 %v862_v0, %v861_v57  ;;  %1723 = vmatpush3.bf16.msra.mxu0 %v1722_v53  ;;  %v1003_v0 = vld [vmem:[%s2771_s3 + $0x170] sm:$0xff]  ;;  %v428_v22 = vld [vmem:[%s2064_s15 + $0x3e8] sm:$0xff]  ;;  %v724_v53 = vrot.slane %v2143_v4, %v2476_v30 }
  0xf3   : > { %v856_v20 = vadd.f32 %v855_v1, %v854_v58  ;;  %661 = vxpose.xlu1.b32.cont [7/16] (narrow) %v421_v54, 16  ;;  %1755 = vmatpush3.bf16.msra.mxu1 %v1754_v35  ;;  %v988_v54 = vld [vmem:[%s2771_s3 + $0xf8] sm:$0xff]  ;;  %v412_v23 = vld [vmem:[%s2064_s15 + $0x368] sm:$0xff] }
  0xf4   : > { %629 = vxpose.xlu0.b32.cont [7/16] (narrow) %v405_v55, 16  ;;  %1725 = vmatprep.subr.bf16.mxu0 %v1724_v40  ;;  %v1019_v55 = vld [vmem:[%s2771_s3 + $0x1f0] sm:$0xff]  ;;  %v1728_v57 = vpack.c.bf16 %v988_v54, %v987_v51  ;;  %v1020_v58 = vld [vmem:[%s2771_s3 + $0x1f8] sm:$0xff] }
  0xf5   : > { %v901_v26 = vcombine.low %v856_v20, %v863_v19  ;;  %1757 = vmatprep.subr.bf16.mxu1 %v1756_v44  ;;  %v1760_v61 = vpack.c.bf16 %v1020_v58, %v1019_v55  ;;  %v1004_v1 = vld [vmem:[%s2771_s3 + $0x178] sm:$0xff]  ;;  %v427_v20 = vld [vmem:[%s2064_s15 + $0x3e0] sm:$0xff] }
  0xf6   : > { %1727 = vmatpush3.bf16.msra.mxu0 %v1726_v45  ;;  %v1762_v2 = vpack.c.bf16 %v1004_v1, %v1003_v0  ;;  %v410_v19 = vld [vmem:[%s2064_s15 + $0x358] sm:$0xff] }
  0xf7   : > { %v2394_v34 = vrot.slane %v901_v26, %v2342_v63  ;;  %662 = vxpose.xlu1.b32.cont [8/16] (narrow) %v422_v17, 16  ;;  %1759 = vmatpush3.bf16.msra.mxu1 %v1758_v50  ;;  %v1796_v17 = vpack.c.bf16 %v1070_v16, %v1069_v10  ;;  %v413_v26 = vld [vmem:[%s2064_s15 + $0x370] sm:$0xff]  ;;  %v2491_v10 = vsub.s32 7, %v2138_v3 }
  0xf8   : > { %630 = vxpose.xlu0.b32.cont [8/16] (narrow) %v406_v18, 16  ;;  %1729 = vmatprep.subr.bf16.mxu0 %v1728_v57  ;;  %v426_v18 = vld [vmem:[%s2064_s15 + $0x3d8] sm:$0xff] }
  0xf9   : > { %v932_v39 = vcombine.low %v2374_v25, %v2394_v34  ;;  %1761 = vmatprep.subr.bf16.mxu1 %v1760_v61  ;;  %v1054_v25 = vld [vmem:[%s2771_s3 + $0x308] sm:$0xff] }
  0xfa   : > { %1731 = vmatpush3.bf16.msra.mxu0 %v1730_v62 }
  0xfb   : > { %663 = vxpose.xlu1.b32.cont [9/16] (narrow) %v423_v32, 16  ;;  %1763 = vmatpush3.bf16.msra.mxu1 %v1762_v2 }
  0xfc   : > { %631 = vxpose.xlu0.b32.cont [9/16] (narrow) %v407_v33, 16  ;;  %1765 = vmatprep.subr.bf16.mxu0 %v1764_v13 }
  0xfd   : > { %1797 = vmatprep.subr.bf16.mxu1 %v1796_v17 }
  0xff   : > { %664 = vxpose.xlu1.b32.cont [10/16] (narrow) %v424_v48, 16 }
 0x100   : > { %632 = vxpose.xlu0.b32.cont [10/16] (narrow) %v408_v49, 16 }
 0x103   : > { %665 = vxpose.xlu1.b32.cont [11/16] (narrow) %v425_v11, 16  ;;  %v2494_v11 = vsub.s32 6, %v2138_v3 }
 0x104   : > { %633 = vxpose.xlu0.b32.cont [11/16] (narrow) %v409_v12, 16  ;;  %v736_v12 = vrot.slane %v2143_v4, %v2491_v10 }
 0x105   : > { %v732_v13 = vrot.slane %v2143_v4, %v2494_v11 }
 0x107   : > { %666 = vxpose.xlu1.b32.cont [12/16] (narrow) %v426_v18, 16  ;;  %v794_v18 = vrot.slane %v2148_v5, %v2491_v10 }
 0x108   : > { %634 = vxpose.xlu0.b32.cont [12/16] (narrow) %v410_v19, 16 }
 0x10b   : > { %667 = vxpose.xlu1.b32.cont [13/16] (narrow) %v427_v20, 16  ;;  %v790_v20 = vrot.slane %v2148_v5, %v2494_v11 }
 0x10c   : > { %635 = vxpose.xlu0.b32.cont [13/16] (narrow) %v411_v21, 16 }
 0x10f   : > { %668 = vxpose.xlu1.b32.cont [14/16] (narrow) %v428_v22, 16 }
 0x110   : > { %636 = vxpose.xlu0.b32.cont [14/16] (narrow) %v412_v23, 16 }
 0x113   : > { %669 = vxpose.xlu1.b32.cont [15/16] (narrow) %v429_v24, 16 }
 0x114   : > { %637 = vxpose.xlu0.b32.cont [15/16] (narrow) %v413_v26, 16 }
 0x117   : > { %670 = vxpose.xlu1.b32.end [16/16] (narrow) %v430_v27, 16 }
 0x118   : > { %638 = vxpose.xlu0.b32.end [16/16] (narrow) %v414_v28, 16 }
 0x11b   : > { %v607_v32 = vpop.trf.xlu1 }
 0x11c   : > { %v575_v33 = vpop.trf.xlu0  ;;  %692 = vst [vmem:[%s2136_s19 + $0x28] sm:$0xff] %v607_v32  ;;  %v750_v35 = vmul.f32 %v728_v52, %v607_v32 }
 0x11d   : > { %691 = vst [vmem:[%s2136_s19 + $0x20] sm:$0xff] %v575_v33  ;;  %v749_v36 = vmul.f32 %v724_v53, %v575_v33 }
 0x11e   : > { %v808_v37 = vadd.f32 %v786_v56, %v750_v35 }
 0x11f   : > { %v807_v38 = vadd.f32 %v782_v31, %v749_v36  ;;  %v608_v40 = vpop.trf.xlu1 }
 0x120   : > { %v576_v41 = vpop.trf.xlu0  ;;  %700 = vst [vmem:[%s2136_s19 + $0x68] sm:$0xff] %v608_v40  ;;  %v758_v42 = vmul.f32 %v728_v52, %v608_v40  ;;  %v824_v44 = vmax.f32 %v808_v37, 0.0 }
 0x121   : > { %699 = vst [vmem:[%s2136_s19 + $0x60] sm:$0xff] %v576_v41  ;;  %v757_v43 = vmul.f32 %v724_v53, %v576_v41  ;;  %v823_v45 = vmax.f32 %v807_v38, 0.0 }
 0x122   : > { %v816_v46 = vadd.f32 %v786_v56, %v758_v42 }
 0x123   : > { %v815_v47 = vadd.f32 %v782_v31, %v757_v43 }
 0x124   : > { %v832_v48 = vmax.f32 %v816_v46, 0.0 }
 0x125   : > { %v831_v49 = vmax.f32 %v815_v47, 0.0 }
 0x126   : > { %v871_v50 = vadd.f32 %v832_v48, %v824_v44 }
 0x127   : > { %v864_v51 = vadd.f32 %v831_v49, %v823_v45 }
 0x128   : > { %v872_v54 = vrot.slane %v871_v50, 4 }
 0x129   : > { %v865_v55 = vrot.slane %v864_v51, 4 }
 0x12a   : > { %v873_v57 = vadd.f32 %v872_v54, %v871_v50 }
 0x12b   : > { %v866_v58 = vadd.f32 %v865_v55, %v864_v51  ;;  %v940_v51 = vrot.slane %v932_v39, %v2342_v63  ;;  %v1021_v55 = vld [vmem:[%s2771_s3 + $0x200] sm:$0xff] }
 0x12c   : > { %v874_v59 = vrot.slane %v873_v57, 2 }
 0x12d   : > { %v867_v60 = vrot.slane %v866_v58, 2 }
 0x12e   : > { %v875_v61 = vadd.f32 %v874_v59, %v873_v57  ;;  %v1053_v59 = vld [vmem:[%s2771_s3 + $0x300] sm:$0xff] }
 0x12f   : > { %v868_v62 = vadd.f32 %v867_v60, %v866_v58  ;;  %v1022_v58 = vld [vmem:[%s2771_s3 + $0x208] sm:$0xff]  ;;  %v1798_v60 = vpack.c.bf16 %v1054_v25, %v1053_v59  ;;  %v1031_v25 = vld [vmem:[%s2771_s3 + $0x250] sm:$0xff] }
 0x130   : > { %v876_v0 = vrot.slane %v875_v61, 1  ;;  %v1766_v39 = vpack.c.bf16 %v1022_v58, %v1021_v55  ;;  %v1079_v55 = vld [vmem:[%s2771_s3 + $0x3d0] sm:$0xff] }
 0x131   : > { %v869_v1 = vrot.slane %v868_v62, 1 }
 0x132   : > { %v877_v2 = vadd.f32 %v876_v0, %v875_v61  ;;  %v1040_v61 = vld [vmem:[%s2771_s3 + $0x298] sm:$0xff] }
 0x133   : > { %v870_v7 = vadd.f32 %v869_v1, %v868_v62  ;;  %v1071_v62 = vld [vmem:[%s2771_s3 + $0x390] sm:$0xff]  ;;  %v1072_v0 = vld [vmem:[%s2771_s3 + $0x398] sm:$0xff] }
 0x135   : > { %v902_v9 = vcombine.low %v870_v7, %v877_v2 }
 0x137   : > { %v924_v48 = vrot.slane %v902_v9, %v2342_v63 }
 0x15b   : > { %v671_v16 = vpop.trf.xlu1 }
 0x15c   : > { %v639_v17 = vpop.trf.xlu0  ;;  %694 = vst [vmem:[%s2136_s19 + $0x38] sm:$0xff] %v671_v16  ;;  %v752_v19 = vmul.f32 %v736_v12, %v671_v16  ;;  %v1800_v16 = vpack.c.bf16 %v1072_v0, %v1071_v62  ;;  %v1064_v62 = vld [vmem:[%s2771_s3 + $0x358] sm:$0xff]  ;;  %v1049_v0 = vld [vmem:[%s2771_s3 + $0x2e0] sm:$0xff] }
 0x15d   : > { %693 = vst [vmem:[%s2136_s19 + $0x30] sm:$0xff] %v639_v17  ;;  %v751_v3 = vmul.f32 %v732_v13, %v639_v17  ;;  %v1042_v17 = vld [vmem:[%s2771_s3 + $0x2a8] sm:$0xff] }
 0x15e   : > { %v810_v23 = vadd.f32 %v794_v18, %v752_v19  ;;  %v1074_v19 = vld [vmem:[%s2771_s3 + $0x3a8] sm:$0xff] }
 0x15f   : > { %v672_v21 = vpop.trf.xlu1  ;;  %v809_v24 = vadd.f32 %v790_v20, %v751_v3 }
 0x160   : > { %v640_v22 = vpop.trf.xlu0  ;;  %702 = vst [vmem:[%s2136_s19 + $0x78] sm:$0xff] %v672_v21  ;;  %v760_v26 = vmul.f32 %v736_v12, %v672_v21  ;;  %v826_v52 = vmax.f32 %v810_v23, 0.0  ;;  %v1023_v12 = vld [vmem:[%s2771_s3 + $0x210] sm:$0xff]  ;;  %v1025_v23 = vld [vmem:[%s2771_s3 + $0x220] sm:$0xff] }
 0x161   : > { %701 = vst [vmem:[%s2136_s19 + $0x70] sm:$0xff] %v640_v22  ;;  %v759_v4 = vmul.f32 %v732_v13, %v640_v22  ;;  %v825_v53 = vmax.f32 %v809_v24, 0.0  ;;  %v1024_v13 = vld [vmem:[%s2771_s3 + $0x218] sm:$0xff]  ;;  %v1026_v24 = vld [vmem:[%s2771_s3 + $0x228] sm:$0xff] }
 0x162   : > { %v818_v27 = vadd.f32 %v794_v18, %v760_v26  ;;  %v1073_v18 = vld [vmem:[%s2771_s3 + $0x3a0] sm:$0xff]  ;;  %v1770_v21 = vpack.c.bf16 %v1024_v13, %v1023_v12 }
 0x163   : > { %v817_v28 = vadd.f32 %v790_v20, %v759_v4  ;;  %v1804_v4 = vpack.c.bf16 %v1074_v19, %v1073_v18  ;;  %v1033_v13 = vld [vmem:[%s2771_s3 + $0x260] sm:$0xff]  ;;  %v1052_v18 = vld [vmem:[%s2771_s3 + $0x2f8] sm:$0xff]  ;;  %v1083_v19 = vld [vmem:[%s2771_s3 + $0x3f0] sm:$0xff] }
 0x164   : > { %v834_v56 = vmax.f32 %v818_v27, 0.0  ;;  %v1043_v27 = vld [vmem:[%s2771_s3 + $0x2b0] sm:$0xff] }
 0x165   : > { %v833_v31 = vmax.f32 %v817_v28, 0.0  ;;  %v1044_v28 = vld [vmem:[%s2771_s3 + $0x2b8] sm:$0xff] }
 0x166   : > { %v885_v32 = vadd.f32 %v834_v56, %v826_v52  ;;  %v1075_v52 = vld [vmem:[%s2771_s3 + $0x3b0] sm:$0xff]  ;;  %v1774_v56 = vpack.c.bf16 %v1026_v24, %v1025_v23 }
 0x167   : > { %v878_v33 = vadd.f32 %v833_v31, %v825_v53  ;;  %v1076_v53 = vld [vmem:[%s2771_s3 + $0x3b8] sm:$0xff] }
 0x168   : > { %v886_v35 = vrot.slane %v885_v32, 4 }
 0x169   : > { %v879_v5 = vrot.slane %v878_v33, 4 }
 0x16a   : > { %v887_v36 = vadd.f32 %v886_v35, %v885_v32  ;;  %v1027_v32 = vld [vmem:[%s2771_s3 + $0x230] sm:$0xff]  ;;  %v1776_v35 = vpack.c.bf16 %v1044_v28, %v1043_v27 }
 0x16b   : > { %v880_v37 = vadd.f32 %v879_v5, %v878_v33  ;;  %v1028_v33 = vld [vmem:[%s2771_s3 + $0x238] sm:$0xff]  ;;  %v1808_v5 = vpack.c.bf16 %v1076_v53, %v1075_v52 }
 0x16c   : > { %v888_v38 = vrot.slane %v887_v36, 2 }
 0x16d   : > { %v881_v40 = vrot.slane %v880_v37, 2 }
 0x16e   : > { %v889_v41 = vadd.f32 %v888_v38, %v887_v36  ;;  %v1059_v36 = vld [vmem:[%s2771_s3 + $0x330] sm:$0xff]  ;;  %v1045_v38 = vld [vmem:[%s2771_s3 + $0x2c0] sm:$0xff] }
 0x16f   : > { %v882_v42 = vadd.f32 %v881_v40, %v880_v37  ;;  %v1060_v37 = vld [vmem:[%s2771_s3 + $0x338] sm:$0xff]  ;;  %v1046_v40 = vld [vmem:[%s2771_s3 + $0x2c8] sm:$0xff] }
 0x170   : > { %v890_v43 = vrot.slane %v889_v41, 1 }
 0x171   : > { %v883_v44 = vrot.slane %v882_v42, 1 }
 0x172   : > { %v891_v45 = vadd.f32 %v890_v43, %v889_v41  ;;  %v1077_v41 = vld [vmem:[%s2771_s3 + $0x3c0] sm:$0xff]  ;;  %v1778_v43 = vpack.c.bf16 %v1028_v33, %v1027_v32 }
 0x173   : > { %v884_v46 = vadd.f32 %v883_v44, %v882_v42  ;;  %v1078_v42 = vld [vmem:[%s2771_s3 + $0x3c8] sm:$0xff]  ;;  %v1810_v44 = vpack.c.bf16 %v1060_v37, %v1059_v36 }
 0x175   : > { %v903_v47 = vcombine.low %v884_v46, %v891_v45  ;;  %v1029_v45 = vld [vmem:[%s2771_s3 + $0x240] sm:$0xff]  ;;  %v1030_v46 = vld [vmem:[%s2771_s3 + $0x248] sm:$0xff] }
 0x176   : > { %v1782_v58 = vpack.c.bf16 %v1030_v46, %v1029_v45 }
 0x177   : > { %v931_v49 = vrot.slane %v903_v47, %v2342_v63  ;;  %v1780_v47 = vpack.c.bf16 %v1046_v40, %v1045_v38 }
 0x179   : > { %v933_v50 = vcombine.low %v924_v48, %v931_v49  ;;  %v1812_v48 = vpack.c.bf16 %v1078_v42, %v1077_v41  ;;  %v1061_v49 = vld [vmem:[%s2771_s3 + $0x340] sm:$0xff] }
 0x17b   : > { %v947_v54 = vrot.slane %v933_v50, %v2342_v63  ;;  %v1039_v63 = vld [vmem:[%s2771_s3 + $0x290] sm:$0xff]  ;;  %v1062_v50 = vld [vmem:[%s2771_s3 + $0x348] sm:$0xff] }
 0x17c   : > { %v1814_v59 = vpack.c.bf16 %v1062_v50, %v1061_v49 }
 0x17d   : > { %v948_v57 = vcombine.low %v940_v51, %v947_v54  ;;  %v1047_v51 = vld [vmem:[%s2771_s3 + $0x2d0] sm:$0xff]  ;;  %v1048_v54 = vld [vmem:[%s2771_s3 + $0x2d8] sm:$0xff] }
 0x17f   : > { %v2527_v34 = vmul.f32 0.0625, %v948_v57  ;;  %v1080_v57 = vld [vmem:[%s2771_s3 + $0x3d8] sm:$0xff] }
 0x181   : > { %v1094_v1 = vrot.slane %v2527_v34, %v2151_v6  ;;  %v1102_v2 = vrot.slane %v2527_v34, %v2205_v14  ;;  %v1090_v7 = vrot.slane %v2527_v34, %v2154_v8  ;;  %v1098_v9 = vrot.slane %v2527_v34, %v2208_v15  ;;  %v1055_v6 = vld [vmem:[%s2771_s3 + $0x310] sm:$0xff]  ;;  %v1056_v14 = vld [vmem:[%s2771_s3 + $0x318] sm:$0xff]  ;;  %v1041_v8 = vld [vmem:[%s2771_s3 + $0x2a0] sm:$0xff] }
 0x182   : > { %v1768_v15 = vpack.c.bf16 %v1040_v61, %v1039_v63  ;;  %v1110_v20 = vrot.slane %v2527_v34, %v2473_v29  ;;  %v1118_v3 = vrot.slane %v2527_v34, %v2491_v10  ;;  %v1802_v22 = vpack.c.bf16 %v1056_v14, %v1055_v6  ;;  %v1057_v29 = vld [vmem:[%s2771_s3 + $0x320] sm:$0xff]  ;;  %v1058_v10 = vld [vmem:[%s2771_s3 + $0x328] sm:$0xff]  ;;  %v1032_v63 = vld [vmem:[%s2771_s3 + $0x258] sm:$0xff] }
 0x183   : > { %1191 = vmatprep.mubr.f32.mxu0 %v1094_v1  ;;  %1261 = vmatprep.mubr.f32.mxu1 %v1102_v2  ;;  %v1772_v26 = vpack.c.bf16 %v1042_v17, %v1041_v8  ;;  %v1806_v31 = vpack.c.bf16 %v1058_v10, %v1057_v29  ;;  %v1063_v61 = vld [vmem:[%s2771_s3 + $0x350] sm:$0xff]  ;;  %v1050_v1 = vld [vmem:[%s2771_s3 + $0x2e8] sm:$0xff]  ;;  %v1081_v2 = vld [vmem:[%s2771_s3 + $0x3e0] sm:$0xff]  ;;  %v1106_v28 = vrot.slane %v2527_v34, %v2476_v30 }
 0x184   : > { %1192 = vmatmul.mubr.f32.vlgmr.msra.gmra.mrb[0].mxu0 %v1090_v7  ;;  %1262 = vmatmul.mubr.f32.vlgmr.msra.gmra.mrb[0].mxu1 %v1098_v9  ;;  %v1082_v7 = vld [vmem:[%s2771_s3 + $0x3e8] sm:$0xff]  ;;  %v1786_v9 = vpack.c.bf16 %v1032_v63, %v1031_v25  ;;  %v1818_v12 = vpack.c.bf16 %v1064_v62, %v1063_v61  ;;  %v1788_v14 = vpack.c.bf16 %v1050_v1, %v1049_v0  ;;  %v1051_v17 = vld [vmem:[%s2771_s3 + $0x2f0] sm:$0xff]  ;;  %v1068_v29 = vld [vmem:[%s2771_s3 + $0x378] sm:$0xff] }
 0x185   : > { %1767 = vmatpush3.bf16.msra.mxu0 %v1766_v39  ;;  %1799 = vmatpush3.bf16.msra.mxu1 %v1798_v60  ;;  %v1784_v39 = vpack.c.bf16 %v1048_v54, %v1047_v51  ;;  %v1816_v60 = vpack.c.bf16 %v1080_v57, %v1079_v55  ;;  %v1034_v6 = vld [vmem:[%s2771_s3 + $0x268] sm:$0xff]  ;;  %v1820_v8 = vpack.c.bf16 %v1082_v7, %v1081_v2 }
 0x186   : > { %1331 = vmatprep.mubr.f32.mxu0 %v1110_v20  ;;  %1401 = vmatprep.mubr.f32.mxu1 %v1118_v3  ;;  %v1084_v20 = vld [vmem:[%s2771_s3 + $0x3f8] sm:$0xff]  ;;  %v1790_v3 = vpack.c.bf16 %v1034_v6, %v1033_v13  ;;  %v1792_v23 = vpack.c.bf16 %v1052_v18, %v1051_v17  ;;  %v1114_v52 = vrot.slane %v2527_v34, %v2494_v11 }
 0x187   : > { %1769 = vmatprep.subr.bf16.mxu0 %v1768_v15  ;;  %1801 = vmatprep.subr.bf16.mxu1 %v1800_v16  ;;  %v1065_v15 = vld [vmem:[%s2771_s3 + $0x360] sm:$0xff]  ;;  %v1066_v16 = vld [vmem:[%s2771_s3 + $0x368] sm:$0xff]  ;;  %v1824_v24 = vpack.c.bf16 %v1084_v20, %v1083_v19 }
 0x189   : > { %1771 = vmatpush3.bf16.msra.mxu0 %v1770_v21  ;;  %1803 = vmatpush3.bf16.msra.mxu1 %v1802_v22  ;;  %v1822_v21 = vpack.c.bf16 %v1066_v16, %v1065_v15  ;;  %v1035_v22 = vld [vmem:[%s2771_s3 + $0x270] sm:$0xff] }
 0x18a   : > { %1773 = vmatprep.subr.bf16.mxu0 %v1772_v26  ;;  %1805 = vmatprep.subr.bf16.mxu1 %v1804_v4  ;;  %v1036_v26 = vld [vmem:[%s2771_s3 + $0x278] sm:$0xff]  ;;  %v1067_v4 = vld [vmem:[%s2771_s3 + $0x370] sm:$0xff] }
 0x18b   : > { %v1794_v10 = vpack.c.bf16 %v1036_v26, %v1035_v22  ;;  %v1826_v27 = vpack.c.bf16 %v1068_v29, %v1067_v4 }
 0x18d   : > { %1775 = vmatpush3.bf16.msra.mxu0 %v1774_v56  ;;  %1807 = vmatpush3.bf16.msra.mxu1 %v1806_v31  ;;  %v1085_v31 = vld [vmem:[%s2772_s4] sm:$0x1] }
 0x18e   : > { %1777 = vmatprep.subr.bf16.mxu0 %v1776_v35  ;;  %1809 = vmatprep.subr.bf16.mxu1 %v1808_v5 }
 0x191   : > { %1779 = vmatpush3.bf16.msra.mxu0 %v1778_v43  ;;  %1811 = vmatpush3.bf16.msra.mxu1 %v1810_v44 }
 0x192   : > { %1781 = vmatprep.subr.bf16.mxu0 %v1780_v47  ;;  %1813 = vmatprep.subr.bf16.mxu1 %v1812_v48 }
 0x195   : > { %1783 = vmatpush3.bf16.msra.mxu0 %v1782_v58  ;;  %1815 = vmatpush3.bf16.msra.mxu1 %v1814_v59 }
 0x196   : > { %1785 = vmatprep.subr.bf16.mxu0 %v1784_v39  ;;  %1817 = vmatprep.subr.bf16.mxu1 %v1816_v60 }
 0x199   : > { %1787 = vmatpush3.bf16.msra.mxu0 %v1786_v9  ;;  %1819 = vmatpush3.bf16.msra.mxu1 %v1818_v12 }
 0x19a   : > { %1789 = vmatprep.subr.bf16.mxu0 %v1788_v14  ;;  %1821 = vmatprep.subr.bf16.mxu1 %v1820_v8 }
 0x19d   : > { %1791 = vmatpush3.bf16.msra.mxu0 %v1790_v3  ;;  %1823 = vmatpush3.bf16.msra.mxu1 %v1822_v21 }
 0x19e   : > { %1793 = vmatprep.subr.bf16.mxu0 %v1792_v23  ;;  %1825 = vmatprep.subr.bf16.mxu1 %v1824_v24 }
 0x1a1   : > { %1795 = vmatpush3.bf16.msra.mxu0 %v1794_v10  ;;  %1827 = vmatpush3.bf16.msra.mxu1 %v1826_v27 }
 0x1a4   : > { %1332 = vmatmul.mubr.f32.vlgmr.msra.gmra.mrb[2].mxu0 %v1106_v28  ;;  %1402 = vmatmul.mubr.f32.vlgmr.msra.gmra.mrb[2].mxu1 %v1114_v52 }
 0x257   : > { %v1592_v53 = vpop.f32.mrb[0].mxu0  ;;  %v1627_v56 = vpop.f32.mrb[0].mxu1 }
 0x258   : > { %v1593_v32 = vpop.f32.mrb[1].mxu0  ;;  %v1628_v33 = vpop.f32.mrb[1].mxu1 }
 0x259   : > { %v1594_v35 = vadd.f32 %v1593_v32, %v1592_v53  ;;  %v1629_v5 = vadd.f32 %v1628_v33, %v1627_v56 }
 0x25b   : > { %v1194_v36 = vadd.f32 %v1594_v35, %v1085_v31 }
 0x25d   : > { %v1264_v37 = vadd.f32 %v1629_v5, %v1194_v36 }
 0x277   : > { %v1662_v30 = vpop.f32.mrb[2].mxu0  ;;  %v1697_v38 = vpop.f32.mrb[2].mxu1 }
 0x278   : > { %v1663_v11 = vpop.f32.mrb[3].mxu0  ;;  %v1698_v34 = vpop.f32.mrb[3].mxu1 }
 0x279   : > { %v1664_v40 = vadd.f32 %v1663_v11, %v1662_v30  ;;  %v1699_v41 = vadd.f32 %v1698_v34, %v1697_v38 }
 0x27b   : > { %v1334_v42 = vadd.f32 %v1664_v40, %v1264_v37 }
 0x27d   : > { %v1404_v43 = vadd.f32 %v1699_v41, %v1334_v42 }
 0x27f   : > { %1407 = vst [vmem:[%s278_s12] sm:$0x1] %v1404_v43 }
 0x280   : > { %1897 = shalt.err (!%p1894_p5)
}
 0x281   : > { %s1898_s27 = scalar_lea.hbm %s2721_s14, 16  ;;  %s1902_s8 = scalar_lea.hbm %s2774_s6, 32 }
 0x282   : > { %p1899_p6 = scmp.ne.s32.totalorder %s2721_s14, %s1898_s27  ;;  %p1903_p10 = scmp.lt.u32.totalorder %s2721_s14, %s2774_s6 }
 0x283   : > { %p1904_p11 = scmp.lt.u32.totalorder %s1902_s8, %s1898_s27  ;;  %p1906_p13 = scmp.lt.u32.totalorder %s1898_s27, %s2721_s14 }
 0x284   : > { %p1900_p7 = pnand %p1899_p6, %p2041_p4 }
 0x285   : > { %p1905_p12 = por %p1904_p11, %p1903_p10 }
 0x286   : > { %p1901_p9 = pneg %p1900_p7 }
 0x287   : > { %p1907_p0 = por %p1906_p13, %p1905_p12 }
 0x289   : > { %p1908_p1 = pnand %p1907_p0, %p1901_p9 }
 0x28b   : > { %1911 = shalt.err (!%p1908_p1)
}
 0x28c   : > { %1828 = dma.vmem_to_hbm [thread:$0]  (%p2041_p4), %s2723_s13, 16, %s2721_s14, %s1419_s16  }
 0x28d PF: > { %p1834_p2 = scmp.ge.s32.totalorder %s1962_s26, 2  ;;  %s1460_s15 = sand.u32 1, %s1942_s21  }
 0x28e   : > { %s1461_s19 = scalar_lea.sflag [#allocation4], %s1460_s15 }
 0x28f   : > { %p1831_p3 = pnand %p1834_p2, %p2048_p8 }
 0x291   : > { %1937 = dma.done.wait (!%p1831_p3), %s1461_s19, 16  }
 0x292   : > { %1939 = vsyncadd (!%p1831_p3), %s1461_s19, 4294967280  ;;  %s20_s26 = sadd.s32 1, %s1962_s26   ;;  %s2777_s21 = smov %s1946_s22 }
 0x293   : > { %p17_p5 = scmp.ge.s32.totalorder %s20_s26, 4   ;;  %s2778_s22 = smov %s1950_s23 }
 0x294   : > { %s2779_s23 = smov %s2054_s10  ;;  %s2780_s24 = smov %s1958_s25 }
 0x295   : > { %s2781_s25 = smov %s2783_s29  ;;  %19 = sbr.rel (!%p17_p5) target bundleno = 4 (0x4), region = 95 }
 0x29c   :  { %1465 = vsyncpa [#allocation4], 1 }
 0x29d   :  { %1467 = vsyncpa [#allocation4 + $0x1], 1 }

</bundles_post_ra>
